<compile_context>
chip_gen: v6e
topology: v6e:2x2x1
jax: 0.10.0
libtpu: 0.0.40
codegen_flags: <defaults>
</compile_context>

<pallas_src>
import math

import jax
import jax.numpy as jnp
from jax import lax
from jax.experimental import pallas as pl
from jax.experimental.pallas import tpu as pltpu

# ----- small config (mirrors the PyTorch Config fields used in forward) -----
B = 2          # batch
T = 8          # seq_length
C = 32         # n_embd
N_HEAD = 4
HEAD_DIM = C // N_HEAD
DROPOUT = 0.0  # inference


def attention_kernel(x_ref, wqkv_ref, bqkv_ref, wproj_ref, bproj_ref,
                     o_ref, attn_ref):
    """Whole (flattened) batch in one step.

    x_ref:     (B*T, C)    input activations (batch*seq flattened)
    wqkv_ref:  (C, 3C)     c_attn weight (x @ W layout)
    bqkv_ref:  (1, 3C)     c_attn bias
    wproj_ref: (C, C)      c_proj weight (x @ W layout)
    bproj_ref: (1, C)      c_proj bias
    o_ref:     (B*T, C)    output
    attn_ref:  (B*T, C)    VMEM scratch for the re-assembled head outputs
    """
    x = x_ref[...]                                          # (B*T, C)

    # --- fused QKV projection over all B*T rows at once ---
    qkv = jnp.dot(x, wqkv_ref[...], preferred_element_type=jnp.float32)
    qkv = qkv + bqkv_ref[...]                               # broadcast (1, 3C)

    inv_sqrt_d = 1.0 / math.sqrt(HEAD_DIM)
    q = qkv[:, 0 * C:1 * C] * inv_sqrt_d                    # scale folded into q
    k = qkv[:, 1 * C:2 * C]
    v = qkv[:, 2 * C:3 * C]

    # causal mask (lower triangular): built ONCE, reused by every (b, h)
    rows = lax.broadcasted_iota(jnp.int32, (T, T), 0)
    cols = lax.broadcasted_iota(jnp.int32, (T, T), 1)
    causal = cols <= rows

    # --- per (batch, head) scaled dot-product attention (static unrolled) ---
    for b in range(B):
        r0 = b * T
        for h in range(N_HEAD):
            c0 = h * HEAD_DIM
            q_bh = q[r0:r0 + T, c0:c0 + HEAD_DIM]           # (T, hd)
            k_bh = k[r0:r0 + T, c0:c0 + HEAD_DIM]           # (T, hd)
            v_bh = v[r0:r0 + T, c0:c0 + HEAD_DIM]           # (T, hd)

            # q @ k^T without materializing a transpose (contract dim 1 of both)
            s = lax.dot_general(
                q_bh, k_bh,
                dimension_numbers=(((1,), (1,)), ((), ())),
                preferred_element_type=jnp.float32)          # (T, T)
            s = jnp.where(causal, s, -jnp.inf)

            # numerically stable softmax; divide goes to the EUP
            m = jnp.max(s, axis=-1, keepdims=True)
            p = jnp.exp(s - m)
            denom = jnp.sum(p, axis=-1, keepdims=True)
            p = p * pl.reciprocal(denom, approx=True)

            out_bh = jnp.dot(p, v_bh, preferred_element_type=jnp.float32)

            # write the head result directly at its (row, column) slot:
            # equivalent to transpose(1, 2).view(B, T, C) re-assembly
            attn_ref[pl.ds(r0, T), pl.ds(c0, HEAD_DIM)] = out_bh

    # --- output projection over all B*T rows at once ---
    y = jnp.dot(attn_ref[...], wproj_ref[...],
                preferred_element_type=jnp.float32)
    o_ref[...] = y + bproj_ref[...]                         # broadcast (1, C)


def causal_self_attention(x, w_qkv, b_qkv, w_proj, b_proj):
    """x: (B, T, C) float32.  Weights in x @ W layout."""
    Bx, Tx, Cx = x.shape
    BT = Bx * Tx
    x2 = x.reshape(BT, Cx)                  # free (contiguous) reshape in XLA
    b_qkv2 = b_qkv.reshape(1, -1)
    b_proj2 = b_proj.reshape(1, -1)

    y2 = pl.pallas_call(
        attention_kernel,
        out_shape=jax.ShapeDtypeStruct((BT, Cx), jnp.float32),
        grid_spec=pltpu.PrefetchScalarGridSpec(
            num_scalar_prefetch=0,
            grid=(1,),                                       # single step: whole
            in_specs=[                                        # problem fits VMEM
                pl.BlockSpec((BT, Cx), lambda i: (0, 0)),         # x  (flattened)
                pl.BlockSpec((Cx, 3 * Cx), lambda i: (0, 0)),     # w_qkv
                pl.BlockSpec((1, 3 * Cx), lambda i: (0, 0)),      # b_qkv
                pl.BlockSpec((Cx, Cx), lambda i: (0, 0)),         # w_proj
                pl.BlockSpec((1, Cx), lambda i: (0, 0)),          # b_proj
            ],
            out_specs=pl.BlockSpec((BT, Cx), lambda i: (0, 0)),
            scratch_shapes=[pltpu.VMEM((BT, Cx), jnp.float32)],   # head re-assembly
        ),
        compiler_params=pltpu.CompilerParams(
            dimension_semantics=("arbitrary",)),
    )(x2, w_qkv, b_qkv2, w_proj, b_proj2)

    return y2.reshape(Bx, Tx, Cx)


def reference_attention(x, w_qkv, b_qkv, w_proj, b_proj):
    """Pure-JAX reference mirroring the PyTorch forward (dropout = identity)."""
    Bx, Tx, Cx = x.shape
    qkv = x @ w_qkv + b_qkv
    q, k, v = jnp.split(qkv, 3, axis=-1)

    def heads(t):  # (B,T,C) -> (B,H,T,hd)
        return t.reshape(Bx, Tx, N_HEAD, HEAD_DIM).transpose(0, 2, 1, 3)

    q, k, v = heads(q), heads(k), heads(v)
    s = (q @ jnp.swapaxes(k, -2, -1)) / jnp.sqrt(jnp.float32(HEAD_DIM))
    mask = jnp.tril(jnp.ones((Tx, Tx), dtype=bool))
    s = jnp.where(mask[None, None], s, -jnp.inf)
    p = jax.nn.softmax(s, axis=-1)
    attn = p @ v                                           # (B,H,T,hd)
    attn = attn.transpose(0, 2, 1, 3).reshape(Bx, Tx, Cx)
    return attn @ w_proj + b_proj


if __name__ == "__main__":
    key = jax.random.PRNGKey(0)
    kx, k1, k2, k3, k4 = jax.random.split(key, 5)

    x = jax.random.normal(kx, (B, T, C), dtype=jnp.float32)

    # Deterministic param init (PyTorch nn.Linear-style uniform bounds).
    bound_attn = 1.0 / math.sqrt(C)
    w_qkv = jax.random.uniform(k1, (C, 3 * C), jnp.float32,
                               -bound_attn, bound_attn)
    b_qkv = jax.random.uniform(k2, (3 * C,), jnp.float32,
                               -bound_attn, bound_attn)
    w_proj = jax.random.uniform(k3, (C, C), jnp.float32,
                                -bound_attn, bound_attn)
    b_proj = jax.random.uniform(k4, (C,), jnp.float32,
                                -bound_attn, bound_attn)

    y = causal_self_attention(x, w_qkv, b_qkv, w_proj, b_proj)
    jax.block_until_ready(y)

    y_ref = reference_attention(x, w_qkv, b_qkv, w_proj, b_proj)
    # tolerance loosened slightly to admit the EUP approx-reciprocal softmax
    assert jnp.allclose(y, y_ref, atol=2e-3, rtol=2e-3), "mismatch vs reference"

    print("KERNEL_OK")
</pallas_src>

<mosaic_0001>
module attributes {stable_mosaic.version = 11 : i64} {
  func.func @attention_kernel(%arg0: i32, %arg1: memref<16x32xf32, #tpu.memory_space<vmem>>, %arg2: memref<32x96xf32, #tpu.memory_space<vmem>>, %arg3: memref<1x96xf32, #tpu.memory_space<vmem>>, %arg4: memref<32x32xf32, #tpu.memory_space<vmem>>, %arg5: memref<1x32xf32, #tpu.memory_space<vmem>>, %arg6: memref<16x32xf32, #tpu.memory_space<vmem>>, %arg7: memref<16x32xf32, #tpu.memory_space<vmem>>) attributes {dimension_semantics = [#tpu.dimension_semantics<arbitrary>], iteration_bounds = array<i64: 1>, scalar_prefetch = 0 : i64, scratch_operands = 1 : i64, tpu.core_type = #tpu.core_type<tc>, window_params = [{pipeline_mode = #tpu.pipeline_mode<synchronous>, transform_indices = @transform_0, window_bounds = array<i64: 16, 32>}, {pipeline_mode = #tpu.pipeline_mode<synchronous>, transform_indices = @transform_1, window_bounds = array<i64: 32, 96>}, {pipeline_mode = #tpu.pipeline_mode<synchronous>, transform_indices = @transform_2, window_bounds = array<i64: 1, 96>}, {pipeline_mode = #tpu.pipeline_mode<synchronous>, transform_indices = @transform_3, window_bounds = array<i64: 32, 32>}, {pipeline_mode = #tpu.pipeline_mode<synchronous>, transform_indices = @transform_4, window_bounds = array<i64: 1, 32>}, {pipeline_mode = #tpu.pipeline_mode<synchronous>, transform_indices = @transform_5, window_bounds = array<i64: 16, 32>}]} {
    %c0 = arith.constant 0 : index
    %c0_0 = arith.constant 0 : index
    %0 = vector.load %arg1[%c0, %c0_0] : memref<16x32xf32, #tpu.memory_space<vmem>>, vector<16x32xf32>
    %c0_1 = arith.constant 0 : index
    %c0_2 = arith.constant 0 : index
    %1 = vector.load %arg2[%c0_1, %c0_2] : memref<32x96xf32, #tpu.memory_space<vmem>>, vector<32x96xf32>
    %cst = arith.constant dense<0.000000e+00> : vector<16x96xf32>
    %2 = tpu.matmul %0, %1, %cst {dimension_numbers = #tpu.dot_dimension_numbers<[1], [0], [0], [1], [0, 0, 1, 1], [], []>} : vector<16x32xf32>, vector<32x96xf32>, vector<16x96xf32> -> vector<16x96xf32>
    %c0_3 = arith.constant 0 : index
    %c0_4 = arith.constant 0 : index
    %3 = vector.load %arg3[%c0_3, %c0_4] : memref<1x96xf32, #tpu.memory_space<vmem>>, vector<1x96xf32>
    %4 = vector.broadcast %3 : vector<1x96xf32> to vector<16x96xf32>
    %5 = arith.addf %2, %4 : vector<16x96xf32>
    %6 = vector.extract_strided_slice %5 {offsets = [0, 0], sizes = [16, 32], strides = [1, 1]} : vector<16x96xf32> to vector<16x32xf32>
    %cst_5 = arith.constant 0.353553385 : f32
    %7 = vector.broadcast %cst_5 : f32 to vector<16x32xf32>
    %8 = arith.mulf %6, %7 : vector<16x32xf32>
    %9 = vector.extract_strided_slice %5 {offsets = [0, 32], sizes = [16, 32], strides = [1, 1]} : vector<16x96xf32> to vector<16x32xf32>
    %10 = vector.extract_strided_slice %5 {offsets = [0, 64], sizes = [16, 32], strides = [1, 1]} : vector<16x96xf32> to vector<16x32xf32>
    %11 = tpu.iota {dimensions = array<i32: 0>} : vector<8x8xi32>
    %12 = tpu.iota {dimensions = array<i32: 1>} : vector<8x8xi32>
    %13 = arith.cmpi sle, %12, %11 : vector<8x8xi32>
    %14 = vector.extract_strided_slice %8 {offsets = [0, 0], sizes = [8, 8], strides = [1, 1]} : vector<16x32xf32> to vector<8x8xf32>
    %15 = vector.extract_strided_slice %9 {offsets = [0, 0], sizes = [8, 8], strides = [1, 1]} : vector<16x32xf32> to vector<8x8xf32>
    %16 = vector.extract_strided_slice %10 {offsets = [0, 0], sizes = [8, 8], strides = [1, 1]} : vector<16x32xf32> to vector<8x8xf32>
    %cst_6 = arith.constant dense<0.000000e+00> : vector<8x8xf32>
    %17 = tpu.matmul %14, %15, %cst_6 {dimension_numbers = #tpu.dot_dimension_numbers<[1], [1], [0], [0], [0, 0, 1, 0], [], []>} : vector<8x8xf32>, vector<8x8xf32>, vector<8x8xf32> -> vector<8x8xf32>
    %cst_7 = arith.constant 0xFF800000 : f32
    %18 = vector.broadcast %cst_7 : f32 to vector<8x8xf32>
    %19 = arith.select %13, %17, %18 : vector<8x8xi1>, vector<8x8xf32>
    %cst_8 = arith.constant dense<0xFF800000> : vector<8xf32>
    %20 = vector.multi_reduction <maximumf>, %19, %cst_8 [1] : vector<8x8xf32> to vector<8xf32>
    %21 = vector.shape_cast %20 : vector<8xf32> to vector<8x1xf32>
    %22 = vector.broadcast %21 : vector<8x1xf32> to vector<8x8xf32>
    %23 = arith.subf %19, %22 : vector<8x8xf32>
    %24 = math.exp %23 : vector<8x8xf32>
    %cst_9 = arith.constant dense<0.000000e+00> : vector<8xf32>
    %25 = vector.multi_reduction <add>, %24, %cst_9 [1] : vector<8x8xf32> to vector<8xf32>
    %26 = vector.shape_cast %25 : vector<8xf32> to vector<8x1xf32>
    %27 = tpu.reciprocal %26 {approx = true} : vector<8x1xf32> -> vector<8x1xf32>
    %28 = vector.broadcast %27 : vector<8x1xf32> to vector<8x8xf32>
    %29 = arith.mulf %24, %28 : vector<8x8xf32>
    %cst_10 = arith.constant dense<0.000000e+00> : vector<8x8xf32>
    %30 = tpu.matmul %29, %16, %cst_10 {dimension_numbers = #tpu.dot_dimension_numbers<[1], [0], [0], [1], [0, 0, 1, 1], [], []>} : vector<8x8xf32>, vector<8x8xf32>, vector<8x8xf32> -> vector<8x8xf32>
    %c0_11 = arith.constant 0 : index
    %c0_12 = arith.constant 0 : index
    %31 = vector.load %arg7[%c0_11, %c0_12] : memref<16x32xf32, #tpu.memory_space<vmem>>, vector<8x8xf32>
    tpu.vector_store %arg7[%c0_11, %c0_12], %30 {strides = array<i32>} : memref<16x32xf32, #tpu.memory_space<vmem>>, vector<8x8xf32>,
    %32 = vector.extract_strided_slice %8 {offsets = [0, 8], sizes = [8, 8], strides = [1, 1]} : vector<16x32xf32> to vector<8x8xf32>
    %33 = vector.extract_strided_slice %9 {offsets = [0, 8], sizes = [8, 8], strides = [1, 1]} : vector<16x32xf32> to vector<8x8xf32>
    %34 = vector.extract_strided_slice %10 {offsets = [0, 8], sizes = [8, 8], strides = [1, 1]} : vector<16x32xf32> to vector<8x8xf32>
    %cst_13 = arith.constant dense<0.000000e+00> : vector<8x8xf32>
    %35 = tpu.matmul %32, %33, %cst_13 {dimension_numbers = #tpu.dot_dimension_numbers<[1], [1], [0], [0], [0, 0, 1, 0], [], []>} : vector<8x8xf32>, vector<8x8xf32>, vector<8x8xf32> -> vector<8x8xf32>
    %cst_14 = arith.constant 0xFF800000 : f32
    %36 = vector.broadcast %cst_14 : f32 to vector<8x8xf32>
    %37 = arith.select %13, %35, %36 : vector<8x8xi1>, vector<8x8xf32>
    %cst_15 = arith.constant dense<0xFF800000> : vector<8xf32>
    %38 = vector.multi_reduction <maximumf>, %37, %cst_15 [1] : vector<8x8xf32> to vector<8xf32>
    %39 = vector.shape_cast %38 : vector<8xf32> to vector<8x1xf32>
    %40 = vector.broadcast %39 : vector<8x1xf32> to vector<8x8xf32>
    %41 = arith.subf %37, %40 : vector<8x8xf32>
    %42 = math.exp %41 : vector<8x8xf32>
    %cst_16 = arith.constant dense<0.000000e+00> : vector<8xf32>
    %43 = vector.multi_reduction <add>, %42, %cst_16 [1] : vector<8x8xf32> to vector<8xf32>
    %44 = vector.shape_cast %43 : vector<8xf32> to vector<8x1xf32>
    %45 = tpu.reciprocal %44 {approx = true} : vector<8x1xf32> -> vector<8x1xf32>
    %46 = vector.broadcast %45 : vector<8x1xf32> to vector<8x8xf32>
    %47 = arith.mulf %42, %46 : vector<8x8xf32>
    %cst_17 = arith.constant dense<0.000000e+00> : vector<8x8xf32>
    %48 = tpu.matmul %47, %34, %cst_17 {dimension_numbers = #tpu.dot_dimension_numbers<[1], [0], [0], [1], [0, 0, 1, 1], [], []>} : vector<8x8xf32>, vector<8x8xf32>, vector<8x8xf32> -> vector<8x8xf32>
    %c0_18 = arith.constant 0 : index
    %c8 = arith.constant 8 : index
    %49 = vector.load %arg7[%c0_18, %c8] : memref<16x32xf32, #tpu.memory_space<vmem>>, vector<8x8xf32>
    tpu.vector_store %arg7[%c0_18, %c8], %48 {strides = array<i32>} : memref<16x32xf32, #tpu.memory_space<vmem>>, vector<8x8xf32>,
    %50 = vector.extract_strided_slice %8 {offsets = [0, 16], sizes = [8, 8], strides = [1, 1]} : vector<16x32xf32> to vector<8x8xf32>
    %51 = vector.extract_strided_slice %9 {offsets = [0, 16], sizes = [8, 8], strides = [1, 1]} : vector<16x32xf32> to vector<8x8xf32>
    %52 = vector.extract_strided_slice %10 {offsets = [0, 16], sizes = [8, 8], strides = [1, 1]} : vector<16x32xf32> to vector<8x8xf32>
    %cst_19 = arith.constant dense<0.000000e+00> : vector<8x8xf32>
    %53 = tpu.matmul %50, %51, %cst_19 {dimension_numbers = #tpu.dot_dimension_numbers<[1], [1], [0], [0], [0, 0, 1, 0], [], []>} : vector<8x8xf32>, vector<8x8xf32>, vector<8x8xf32> -> vector<8x8xf32>
    %cst_20 = arith.constant 0xFF800000 : f32
    %54 = vector.broadcast %cst_20 : f32 to vector<8x8xf32>
    %55 = arith.select %13, %53, %54 : vector<8x8xi1>, vector<8x8xf32>
    %cst_21 = arith.constant dense<0xFF800000> : vector<8xf32>
    %56 = vector.multi_reduction <maximumf>, %55, %cst_21 [1] : vector<8x8xf32> to vector<8xf32>
    %57 = vector.shape_cast %56 : vector<8xf32> to vector<8x1xf32>
    %58 = vector.broadcast %57 : vector<8x1xf32> to vector<8x8xf32>
    %59 = arith.subf %55, %58 : vector<8x8xf32>
    %60 = math.exp %59 : vector<8x8xf32>
    %cst_22 = arith.constant dense<0.000000e+00> : vector<8xf32>
    %61 = vector.multi_reduction <add>, %60, %cst_22 [1] : vector<8x8xf32> to vector<8xf32>
    %62 = vector.shape_cast %61 : vector<8xf32> to vector<8x1xf32>
    %63 = tpu.reciprocal %62 {approx = true} : vector<8x1xf32> -> vector<8x1xf32>
    %64 = vector.broadcast %63 : vector<8x1xf32> to vector<8x8xf32>
    %65 = arith.mulf %60, %64 : vector<8x8xf32>
    %cst_23 = arith.constant dense<0.000000e+00> : vector<8x8xf32>
    %66 = tpu.matmul %65, %52, %cst_23 {dimension_numbers = #tpu.dot_dimension_numbers<[1], [0], [0], [1], [0, 0, 1, 1], [], []>} : vector<8x8xf32>, vector<8x8xf32>, vector<8x8xf32> -> vector<8x8xf32>
    %c0_24 = arith.constant 0 : index
    %c16 = arith.constant 16 : index
    %67 = vector.load %arg7[%c0_24, %c16] : memref<16x32xf32, #tpu.memory_space<vmem>>, vector<8x8xf32>
    tpu.vector_store %arg7[%c0_24, %c16], %66 {strides = array<i32>} : memref<16x32xf32, #tpu.memory_space<vmem>>, vector<8x8xf32>,
    %68 = vector.extract_strided_slice %8 {offsets = [0, 24], sizes = [8, 8], strides = [1, 1]} : vector<16x32xf32> to vector<8x8xf32>
    %69 = vector.extract_strided_slice %9 {offsets = [0, 24], sizes = [8, 8], strides = [1, 1]} : vector<16x32xf32> to vector<8x8xf32>
    %70 = vector.extract_strided_slice %10 {offsets = [0, 24], sizes = [8, 8], strides = [1, 1]} : vector<16x32xf32> to vector<8x8xf32>
    %cst_25 = arith.constant dense<0.000000e+00> : vector<8x8xf32>
    %71 = tpu.matmul %68, %69, %cst_25 {dimension_numbers = #tpu.dot_dimension_numbers<[1], [1], [0], [0], [0, 0, 1, 0], [], []>} : vector<8x8xf32>, vector<8x8xf32>, vector<8x8xf32> -> vector<8x8xf32>
    %cst_26 = arith.constant 0xFF800000 : f32
    %72 = vector.broadcast %cst_26 : f32 to vector<8x8xf32>
    %73 = arith.select %13, %71, %72 : vector<8x8xi1>, vector<8x8xf32>
    %cst_27 = arith.constant dense<0xFF800000> : vector<8xf32>
    %74 = vector.multi_reduction <maximumf>, %73, %cst_27 [1] : vector<8x8xf32> to vector<8xf32>
    %75 = vector.shape_cast %74 : vector<8xf32> to vector<8x1xf32>
    %76 = vector.broadcast %75 : vector<8x1xf32> to vector<8x8xf32>
    %77 = arith.subf %73, %76 : vector<8x8xf32>
    %78 = math.exp %77 : vector<8x8xf32>
    %cst_28 = arith.constant dense<0.000000e+00> : vector<8xf32>
    %79 = vector.multi_reduction <add>, %78, %cst_28 [1] : vector<8x8xf32> to vector<8xf32>
    %80 = vector.shape_cast %79 : vector<8xf32> to vector<8x1xf32>
    %81 = tpu.reciprocal %80 {approx = true} : vector<8x1xf32> -> vector<8x1xf32>
    %82 = vector.broadcast %81 : vector<8x1xf32> to vector<8x8xf32>
    %83 = arith.mulf %78, %82 : vector<8x8xf32>
    %cst_29 = arith.constant dense<0.000000e+00> : vector<8x8xf32>
    %84 = tpu.matmul %83, %70, %cst_29 {dimension_numbers = #tpu.dot_dimension_numbers<[1], [0], [0], [1], [0, 0, 1, 1], [], []>} : vector<8x8xf32>, vector<8x8xf32>, vector<8x8xf32> -> vector<8x8xf32>
    %c0_30 = arith.constant 0 : index
    %c24 = arith.constant 24 : index
    %85 = vector.load %arg7[%c0_30, %c24] : memref<16x32xf32, #tpu.memory_space<vmem>>, vector<8x8xf32>
    tpu.vector_store %arg7[%c0_30, %c24], %84 {strides = array<i32>} : memref<16x32xf32, #tpu.memory_space<vmem>>, vector<8x8xf32>,
    %86 = vector.extract_strided_slice %8 {offsets = [8, 0], sizes = [8, 8], strides = [1, 1]} : vector<16x32xf32> to vector<8x8xf32>
    %87 = vector.extract_strided_slice %9 {offsets = [8, 0], sizes = [8, 8], strides = [1, 1]} : vector<16x32xf32> to vector<8x8xf32>
    %88 = vector.extract_strided_slice %10 {offsets = [8, 0], sizes = [8, 8], strides = [1, 1]} : vector<16x32xf32> to vector<8x8xf32>
    %cst_31 = arith.constant dense<0.000000e+00> : vector<8x8xf32>
    %89 = tpu.matmul %86, %87, %cst_31 {dimension_numbers = #tpu.dot_dimension_numbers<[1], [1], [0], [0], [0, 0, 1, 0], [], []>} : vector<8x8xf32>, vector<8x8xf32>, vector<8x8xf32> -> vector<8x8xf32>
    %cst_32 = arith.constant 0xFF800000 : f32
    %90 = vector.broadcast %cst_32 : f32 to vector<8x8xf32>
    %91 = arith.select %13, %89, %90 : vector<8x8xi1>, vector<8x8xf32>
    %cst_33 = arith.constant dense<0xFF800000> : vector<8xf32>
    %92 = vector.multi_reduction <maximumf>, %91, %cst_33 [1] : vector<8x8xf32> to vector<8xf32>
    %93 = vector.shape_cast %92 : vector<8xf32> to vector<8x1xf32>
    %94 = vector.broadcast %93 : vector<8x1xf32> to vector<8x8xf32>
    %95 = arith.subf %91, %94 : vector<8x8xf32>
    %96 = math.exp %95 : vector<8x8xf32>
    %cst_34 = arith.constant dense<0.000000e+00> : vector<8xf32>
    %97 = vector.multi_reduction <add>, %96, %cst_34 [1] : vector<8x8xf32> to vector<8xf32>
    %98 = vector.shape_cast %97 : vector<8xf32> to vector<8x1xf32>
    %99 = tpu.reciprocal %98 {approx = true} : vector<8x1xf32> -> vector<8x1xf32>
    %100 = vector.broadcast %99 : vector<8x1xf32> to vector<8x8xf32>
    %101 = arith.mulf %96, %100 : vector<8x8xf32>
    %cst_35 = arith.constant dense<0.000000e+00> : vector<8x8xf32>
    %102 = tpu.matmul %101, %88, %cst_35 {dimension_numbers = #tpu.dot_dimension_numbers<[1], [0], [0], [1], [0, 0, 1, 1], [], []>} : vector<8x8xf32>, vector<8x8xf32>, vector<8x8xf32> -> vector<8x8xf32>
    %c8_36 = arith.constant 8 : index
    %c0_37 = arith.constant 0 : index
    %103 = vector.load %arg7[%c8_36, %c0_37] : memref<16x32xf32, #tpu.memory_space<vmem>>, vector<8x8xf32>
    tpu.vector_store %arg7[%c8_36, %c0_37], %102 {strides = array<i32>} : memref<16x32xf32, #tpu.memory_space<vmem>>, vector<8x8xf32>,
    %104 = vector.extract_strided_slice %8 {offsets = [8, 8], sizes = [8, 8], strides = [1, 1]} : vector<16x32xf32> to vector<8x8xf32>
    %105 = vector.extract_strided_slice %9 {offsets = [8, 8], sizes = [8, 8], strides = [1, 1]} : vector<16x32xf32> to vector<8x8xf32>
    %106 = vector.extract_strided_slice %10 {offsets = [8, 8], sizes = [8, 8], strides = [1, 1]} : vector<16x32xf32> to vector<8x8xf32>
    %cst_38 = arith.constant dense<0.000000e+00> : vector<8x8xf32>
    %107 = tpu.matmul %104, %105, %cst_38 {dimension_numbers = #tpu.dot_dimension_numbers<[1], [1], [0], [0], [0, 0, 1, 0], [], []>} : vector<8x8xf32>, vector<8x8xf32>, vector<8x8xf32> -> vector<8x8xf32>
    %cst_39 = arith.constant 0xFF800000 : f32
    %108 = vector.broadcast %cst_39 : f32 to vector<8x8xf32>
    %109 = arith.select %13, %107, %108 : vector<8x8xi1>, vector<8x8xf32>
    %cst_40 = arith.constant dense<0xFF800000> : vector<8xf32>
    %110 = vector.multi_reduction <maximumf>, %109, %cst_40 [1] : vector<8x8xf32> to vector<8xf32>
    %111 = vector.shape_cast %110 : vector<8xf32> to vector<8x1xf32>
    %112 = vector.broadcast %111 : vector<8x1xf32> to vector<8x8xf32>
    %113 = arith.subf %109, %112 : vector<8x8xf32>
    %114 = math.exp %113 : vector<8x8xf32>
    %cst_41 = arith.constant dense<0.000000e+00> : vector<8xf32>
    %115 = vector.multi_reduction <add>, %114, %cst_41 [1] : vector<8x8xf32> to vector<8xf32>
    %116 = vector.shape_cast %115 : vector<8xf32> to vector<8x1xf32>
    %117 = tpu.reciprocal %116 {approx = true} : vector<8x1xf32> -> vector<8x1xf32>
    %118 = vector.broadcast %117 : vector<8x1xf32> to vector<8x8xf32>
    %119 = arith.mulf %114, %118 : vector<8x8xf32>
    %cst_42 = arith.constant dense<0.000000e+00> : vector<8x8xf32>
    %120 = tpu.matmul %119, %106, %cst_42 {dimension_numbers = #tpu.dot_dimension_numbers<[1], [0], [0], [1], [0, 0, 1, 1], [], []>} : vector<8x8xf32>, vector<8x8xf32>, vector<8x8xf32> -> vector<8x8xf32>
    %c8_43 = arith.constant 8 : index
    %c8_44 = arith.constant 8 : index
    %121 = vector.load %arg7[%c8_43, %c8_44] : memref<16x32xf32, #tpu.memory_space<vmem>>, vector<8x8xf32>
    tpu.vector_store %arg7[%c8_43, %c8_44], %120 {strides = array<i32>} : memref<16x32xf32, #tpu.memory_space<vmem>>, vector<8x8xf32>,
    %122 = vector.extract_strided_slice %8 {offsets = [8, 16], sizes = [8, 8], strides = [1, 1]} : vector<16x32xf32> to vector<8x8xf32>
    %123 = vector.extract_strided_slice %9 {offsets = [8, 16], sizes = [8, 8], strides = [1, 1]} : vector<16x32xf32> to vector<8x8xf32>
    %124 = vector.extract_strided_slice %10 {offsets = [8, 16], sizes = [8, 8], strides = [1, 1]} : vector<16x32xf32> to vector<8x8xf32>
    %cst_45 = arith.constant dense<0.000000e+00> : vector<8x8xf32>
    %125 = tpu.matmul %122, %123, %cst_45 {dimension_numbers = #tpu.dot_dimension_numbers<[1], [1], [0], [0], [0, 0, 1, 0], [], []>} : vector<8x8xf32>, vector<8x8xf32>, vector<8x8xf32> -> vector<8x8xf32>
    %cst_46 = arith.constant 0xFF800000 : f32
    %126 = vector.broadcast %cst_46 : f32 to vector<8x8xf32>
    %127 = arith.select %13, %125, %126 : vector<8x8xi1>, vector<8x8xf32>
    %cst_47 = arith.constant dense<0xFF800000> : vector<8xf32>
    %128 = vector.multi_reduction <maximumf>, %127, %cst_47 [1] : vector<8x8xf32> to vector<8xf32>
    %129 = vector.shape_cast %128 : vector<8xf32> to vector<8x1xf32>
    %130 = vector.broadcast %129 : vector<8x1xf32> to vector<8x8xf32>
    %131 = arith.subf %127, %130 : vector<8x8xf32>
    %132 = math.exp %131 : vector<8x8xf32>
    %cst_48 = arith.constant dense<0.000000e+00> : vector<8xf32>
    %133 = vector.multi_reduction <add>, %132, %cst_48 [1] : vector<8x8xf32> to vector<8xf32>
    %134 = vector.shape_cast %133 : vector<8xf32> to vector<8x1xf32>
    %135 = tpu.reciprocal %134 {approx = true} : vector<8x1xf32> -> vector<8x1xf32>
    %136 = vector.broadcast %135 : vector<8x1xf32> to vector<8x8xf32>
    %137 = arith.mulf %132, %136 : vector<8x8xf32>
    %cst_49 = arith.constant dense<0.000000e+00> : vector<8x8xf32>
    %138 = tpu.matmul %137, %124, %cst_49 {dimension_numbers = #tpu.dot_dimension_numbers<[1], [0], [0], [1], [0, 0, 1, 1], [], []>} : vector<8x8xf32>, vector<8x8xf32>, vector<8x8xf32> -> vector<8x8xf32>
    %c8_50 = arith.constant 8 : index
    %c16_51 = arith.constant 16 : index
    %139 = vector.load %arg7[%c8_50, %c16_51] : memref<16x32xf32, #tpu.memory_space<vmem>>, vector<8x8xf32>
    tpu.vector_store %arg7[%c8_50, %c16_51], %138 {strides = array<i32>} : memref<16x32xf32, #tpu.memory_space<vmem>>, vector<8x8xf32>,
    %140 = vector.extract_strided_slice %8 {offsets = [8, 24], sizes = [8, 8], strides = [1, 1]} : vector<16x32xf32> to vector<8x8xf32>
    %141 = vector.extract_strided_slice %9 {offsets = [8, 24], sizes = [8, 8], strides = [1, 1]} : vector<16x32xf32> to vector<8x8xf32>
    %142 = vector.extract_strided_slice %10 {offsets = [8, 24], sizes = [8, 8], strides = [1, 1]} : vector<16x32xf32> to vector<8x8xf32>
    %cst_52 = arith.constant dense<0.000000e+00> : vector<8x8xf32>
    %143 = tpu.matmul %140, %141, %cst_52 {dimension_numbers = #tpu.dot_dimension_numbers<[1], [1], [0], [0], [0, 0, 1, 0], [], []>} : vector<8x8xf32>, vector<8x8xf32>, vector<8x8xf32> -> vector<8x8xf32>
    %cst_53 = arith.constant 0xFF800000 : f32
    %144 = vector.broadcast %cst_53 : f32 to vector<8x8xf32>
    %145 = arith.select %13, %143, %144 : vector<8x8xi1>, vector<8x8xf32>
    %cst_54 = arith.constant dense<0xFF800000> : vector<8xf32>
    %146 = vector.multi_reduction <maximumf>, %145, %cst_54 [1] : vector<8x8xf32> to vector<8xf32>
    %147 = vector.shape_cast %146 : vector<8xf32> to vector<8x1xf32>
    %148 = vector.broadcast %147 : vector<8x1xf32> to vector<8x8xf32>
    %149 = arith.subf %145, %148 : vector<8x8xf32>
    %150 = math.exp %149 : vector<8x8xf32>
    %cst_55 = arith.constant dense<0.000000e+00> : vector<8xf32>
    %151 = vector.multi_reduction <add>, %150, %cst_55 [1] : vector<8x8xf32> to vector<8xf32>
    %152 = vector.shape_cast %151 : vector<8xf32> to vector<8x1xf32>
    %153 = tpu.reciprocal %152 {approx = true} : vector<8x1xf32> -> vector<8x1xf32>
    %154 = vector.broadcast %153 : vector<8x1xf32> to vector<8x8xf32>
    %155 = arith.mulf %150, %154 : vector<8x8xf32>
    %cst_56 = arith.constant dense<0.000000e+00> : vector<8x8xf32>
    %156 = tpu.matmul %155, %142, %cst_56 {dimension_numbers = #tpu.dot_dimension_numbers<[1], [0], [0], [1], [0, 0, 1, 1], [], []>} : vector<8x8xf32>, vector<8x8xf32>, vector<8x8xf32> -> vector<8x8xf32>
    %c8_57 = arith.constant 8 : index
    %c24_58 = arith.constant 24 : index
    %157 = vector.load %arg7[%c8_57, %c24_58] : memref<16x32xf32, #tpu.memory_space<vmem>>, vector<8x8xf32>
    tpu.vector_store %arg7[%c8_57, %c24_58], %156 {strides = array<i32>} : memref<16x32xf32, #tpu.memory_space<vmem>>, vector<8x8xf32>,
    %c0_59 = arith.constant 0 : index
    %c0_60 = arith.constant 0 : index
    %158 = vector.load %arg7[%c0_59, %c0_60] : memref<16x32xf32, #tpu.memory_space<vmem>>, vector<16x32xf32>
    %c0_61 = arith.constant 0 : index
    %c0_62 = arith.constant 0 : index
    %159 = vector.load %arg4[%c0_61, %c0_62] : memref<32x32xf32, #tpu.memory_space<vmem>>, vector<32x32xf32>
    %cst_63 = arith.constant dense<0.000000e+00> : vector<16x32xf32>
    %160 = tpu.matmul %158, %159, %cst_63 {dimension_numbers = #tpu.dot_dimension_numbers<[1], [0], [0], [1], [0, 0, 1, 1], [], []>} : vector<16x32xf32>, vector<32x32xf32>, vector<16x32xf32> -> vector<16x32xf32>
    %c0_64 = arith.constant 0 : index
    %c0_65 = arith.constant 0 : index
    %161 = vector.load %arg5[%c0_64, %c0_65] : memref<1x32xf32, #tpu.memory_space<vmem>>, vector<1x32xf32>
    %162 = vector.broadcast %161 : vector<1x32xf32> to vector<16x32xf32>
    %163 = arith.addf %160, %162 : vector<16x32xf32>
    %c0_66 = arith.constant 0 : index
    %c0_67 = arith.constant 0 : index
    %164 = vector.load %arg6[%c0_66, %c0_67] : memref<16x32xf32, #tpu.memory_space<vmem>>, vector<16x32xf32>
    tpu.vector_store %arg6[%c0_66, %c0_67], %163 {strides = array<i32>} : memref<16x32xf32, #tpu.memory_space<vmem>>, vector<16x32xf32>,
    return
  }
  func.func @transform_0(%arg0: i32) -> (i32, i32) {
    %c0_i32 = arith.constant 0 : i32
    %c0_i32_0 = arith.constant 0 : i32
    %c0_i32_1 = arith.constant 0 : i32
    return %c0_i32, %c0_i32_0 : i32, i32
  }
  func.func @transform_1(%arg0: i32) -> (i32, i32) {
    %c0_i32 = arith.constant 0 : i32
    %c0_i32_0 = arith.constant 0 : i32
    %c0_i32_1 = arith.constant 0 : i32
    return %c0_i32, %c0_i32_0 : i32, i32
  }
  func.func @transform_2(%arg0: i32) -> (i32, i32) {
    %c0_i32 = arith.constant 0 : i32
    %c0_i32_0 = arith.constant 0 : i32
    %c0_i32_1 = arith.constant 0 : i32
    return %c0_i32, %c0_i32_0 : i32, i32
  }
  func.func @transform_3(%arg0: i32) -> (i32, i32) {
    %c0_i32 = arith.constant 0 : i32
    %c0_i32_0 = arith.constant 0 : i32
    %c0_i32_1 = arith.constant 0 : i32
    return %c0_i32, %c0_i32_0 : i32, i32
  }
  func.func @transform_4(%arg0: i32) -> (i32, i32) {
    %c0_i32 = arith.constant 0 : i32
    %c0_i32_0 = arith.constant 0 : i32
    %c0_i32_1 = arith.constant 0 : i32
    return %c0_i32, %c0_i32_0 : i32, i32
  }
  func.func @transform_5(%arg0: i32) -> (i32, i32) {
    %c0_i32 = arith.constant 0 : i32
    %c0_i32_0 = arith.constant 0 : i32
    %c0_i32_1 = arith.constant 0 : i32
    return %c0_i32, %c0_i32_0 : i32, i32
  }
}

</mosaic_0001>

<bundles_post_ra>
// kernel: tpu_custom_call.1
= control target key start
LH: loop header
LB: loop body
LE: loop exit
PB: predicated region body
PF: predicated region fallthrough
CT: control target
= control target key end

     0   :  { %10 = vsyncpa [#allocation4], 0  ;;  %s2224_s0 = inlined_call_operand.hbm [shape: f32[16,32], index: 0, kind: input, shape index: {}]   ;;  %s2225_s1 = inlined_call_operand.hbm [shape: f32[32,96], index: 1, kind: input, shape index: {}]   ;;  %s2226_s2 = inlined_call_operand.vmem [shape: f32[1,96], index: 2, kind: input, shape index: {}]   ;;  %s2227_s3 = inlined_call_operand.hbm [shape: f32[32,32], index: 3, kind: input, shape index: {}]   ;;  %s2228_s4 = inlined_call_operand.vmem [shape: f32[1,32], index: 4, kind: input, shape index: {}]   ;;  %s2229_s5 = inlined_call_operand.hbm [shape: f32[16,32], index: 5, kind: output, shape index: {}]  }
   0x1   :  { %11 = vsyncpa [#allocation7], 0 }
   0x2   :  { %12 = vsyncpa [#allocation5], 0  ;;  %s1957_s18 = smov [#allocation6]   ;;  %s1958_s20 = smov [#allocation3]  }
   0x3   :  { %s30_s19 = sshll.u32 %s1957_s18, 4  ;;  %s18_s21 = sshll.u32 %s1958_s20, 4  ;;  %s31_s19 = int_to_ptr.vmem [resolvable:$true] %s30_s19  ;;  %s19_s21 = int_to_ptr.vmem [resolvable:$true] %s18_s21 }
   0x4   :  { %s1879_s22 = scalar_lea.vmem %s31_s19, 512  ;;  %p1884_p1 = scmp.lt.s32.totalorder %s31_s19, %s31_s19 }
   0x5   :  { %p1880_p0 = scmp.ne.s32.totalorder %s31_s19, %s1879_s22  ;;  %p1885_p2 = scmp.lt.s32.totalorder %s1879_s22, %s1879_s22 }
   0x7   :  { %p1886_p3 = por %p1885_p2, %p1884_p1 }
   0x9   :  { %p1887_p4 = pnand %p1886_p3, %p1880_p0 }
   0xb   :  { %1890 = shalt.err (!%p1887_p4)
}
   0xc   :  { %s1959_s23 = smov 128   ;;  %s1960_s24 = smov 8  }
   0xd   :  { %36 = dma.hbm_to_vmem [thread:$0]  %s2225_s1, 512, %s31_s19, [#allocation7], %s1959_s23, %s1959_s23, %s1960_s24  }
   0xe   :  { %s1899_s27 = scalar_lea.vmem %s19_s21, 256  ;;  %p1904_p6 = scmp.lt.s32.totalorder %s19_s21, %s19_s21 }
   0xf   :  { %p1900_p5 = scmp.ne.s32.totalorder %s19_s21, %s1899_s27  ;;  %p1905_p7 = scmp.lt.s32.totalorder %s1899_s27, %s1899_s27 }
  0x11   :  { %p1906_p8 = por %p1905_p7, %p1904_p6 }
  0x13   :  { %p1907_p9 = pnand %p1906_p8, %p1900_p5 }
  0x15   :  { %1910 = shalt.err (!%p1907_p9)
}
  0x16   :  { %24 = dma.hbm_to_vmem [thread:$0]  %s2224_s0, 256, %s19_s21, [#allocation4], %s1959_s23, %s1959_s23, %s1960_s24  }
  0x17   :  { %s1961_s30 = smov [#allocation8]  }
  0x18   :  { %s44_s6 = sshll.u32 %s1961_s30, 4  ;;  %s45_s6 = int_to_ptr.vmem [resolvable:$true] %s44_s6 }
  0x19   :  { %s1919_s7 = scalar_lea.vmem %s45_s6, 512  ;;  %p1924_p11 = scmp.lt.s32.totalorder %s45_s6, %s45_s6 }
  0x1a   :  { %p1920_p10 = scmp.ne.s32.totalorder %s45_s6, %s1919_s7  ;;  %p1925_p12 = scmp.lt.s32.totalorder %s1919_s7, %s1919_s7 }
  0x1c   :  { %p1926_p13 = por %p1925_p12, %p1924_p11 }
  0x1e   :  { %p1927_p0 = pnand %p1926_p13, %p1920_p10 }
  0x20   :  { %1930 = shalt.err (!%p1927_p0)
}
  0x21   :  { %50 = dma.hbm_to_vmem [thread:$0]  %s2227_s3, 512, %s45_s6, [#allocation7], %s1959_s23, %s1959_s23, %s1960_s24  }
  0x22   :  { %1951 = dma.done.wait [#allocation4], 256  }
  0x23   :  { %1952 = vsyncadd [#allocation4], 4294967040 }
  0x24   :  { %1953 = dma.done.wait [#allocation7], 1024  }
  0x25   :  { %1954 = vsyncadd [#allocation7], 4294966272  ;;  %vm75_vm0 = vcmask 261120   ;;  %v67_v0 = vld [vmem:[#allocation6 + $0x18] sm:$0xff]  ;;  %v66_v1 = vld [vmem:[#allocation6 + $0x10] sm:$0xff]  ;;  %v1962_v6 = vmov 0.0   ;;  %v159_v19 = vlaneseq }
  0x26   :  { %1716 = vmatprep.subr.mxu0 %v67_v0  ;;  %v62_v2 = vld [vmem:[#allocation3] sm:$0xff]  ;;  %v65_v3 = vld [vmem:[#allocation6 + $0x8] sm:$0xff]  ;;  %v64_v4 = vld [vmem:[#allocation6] sm:$0xff]  ;;  %1727 = vmatprep.subr.mxu1 %v1962_v6  ;;  %vm1963_vm1 = vmmov 0   ;;  %s1964_s9 = smov 64   ;;  %s1965_s10 = smov 96  }
  0x27   :  { %1717 = vmatpush3.msra.mxu0 %v67_v0  ;;  %1724 = vmatprep.mubr.msk.f32.mxu0 %vm75_vm0, %v62_v2  ;;  %v63_v5 = vld [vmem:[#allocation3 + $0x8] sm:$0xff]  ;;  %v1642_v7 = vld [vmem:[%s2226_s2] ss:$0 sm:$0xff]  ;;  %s1966_s11 = smov 88   ;;  %s1967_s2 = smov 120   ;;  %vm167_vm2 = vcmask 64512  }
  0x28   :  { %1718 = vmatprep.subr.mxu0 %v66_v1  ;;  %1729 = vmatprep.mubr.msk.f32.mxu1 %vm1963_vm1, %v1962_v6  ;;  %s1968_s12 = smov 80   ;;  %s1969_s13 = smov 112   ;;  %v160_v20 = vshrl.u32 %v159_v19, 7  ;;  %v162_v21 = vand.u32 127, %v159_v19  ;;  %vm502_vm4 = vcmask 130112   ;;  %vm674_vm5 = vcmask 195712  }
  0x29   :  { %1719 = vmatpush3.msra.mxu0 %v66_v1  ;;  %s1970_s14 = smov 72   ;;  %s1971_s15 = smov 104   ;;  %vm846_vm6 = vcmask 261312  }
  0x2a   :  { %1720 = vmatprep.subr.mxu0 %v65_v3  ;;  %vm2067_vm3 = vcmp.le.s32.totalorder %v162_v21, %v160_v20  ;;  %s1972_s16 = smov 48   ;;  %s1973_s17 = smov 56  }
  0x2b   :  { %1721 = vmatpush3.msra.mxu0 %v65_v3  ;;  %s1974_s18 = smov 40   ;;  %s1975_s19 = smov 16  }
  0x2c   :  { %1722 = vmatprep.subr.mxu0 %v64_v4  ;;  %s1976_s20 = smov 24   ;;  %s1977_s25 = smov [#allocation9]  }
  0x2d   :  { %1723 = vmatpush3.msra.mxu0 %v64_v4  ;;  %s1629_s26 = sshll.u32 %s1977_s25, 4  ;;  %s1630_s26 = int_to_ptr.vmem [resolvable:$true] %s1629_s26 }
  0x2e   :  { %1725 = vmatmul.mubr.msk.f32.vlgmr.msra.gmra.mxu0 %vm75_vm0, %v63_v5  ;;  %1747 = vmatprep.subr.mxu0 %v1962_v6  ;;  %s1931_s27 = scalar_lea.vmem %s1630_s26, 256  ;;  %p1936_p2 = scmp.lt.s32.totalorder %s1630_s26, %s1630_s26 }
  0x2f   :  { %1749 = vmatprep.mubr.msk.f32.mxu0 %vm1963_vm1, %v1962_v6  ;;  %p1932_p1 = scmp.ne.s32.totalorder %s1630_s26, %s1931_s27  ;;  %p1937_p3 = scmp.lt.s32.totalorder %s1931_s27, %s1931_s27 }
  0x31   :  { %p1938_p4 = por %p1937_p3, %p1936_p2 }
  0x33   :  { %p1939_p5 = pnand %p1938_p4, %p1932_p1 }
  0xee   :  { %v1726_v8 = vpop.f32.mrf.mxu0 }
  0xef   :  { %v2037_v9 = vadd.f32 %v1726_v8, %v1642_v7 }
  0xf0   :  { %v148_v10 = vpop.f32.mrf.mxu0 }
  0xf1   :  { %v2039_v11 = vadd.f32 %v1642_v7, %v148_v10  ;;  %v158_v29 = vmul.f32 0.35355338, %v2037_v9 }
  0xf3   :  { %255 = vrot.lane.b32.xlu1 %v2039_v11, %s1964_s9  ;;  %165 = vrot.lane.b32.xlu0 %v2039_v11, %s1965_s10  ;;  %v157_v12 = vmul.f32 0.35355338, %v2039_v11 }
  0xf7   :  { %334 = vrot.lane.b32.xlu1 %v2039_v11, %s1966_s11 }
  0xfb   :  { %332 = vrot.lane.b32.xlu1 %v157_v12, %s1967_s2 }
  0xff   :  { %506 = vrot.lane.b32.xlu1 %v2039_v11, %s1968_s12 }
 0x103   :  { %504 = vrot.lane.b32.xlu1 %v157_v12, %s1969_s13 }
 0x165   :  { %v256_v13 = vpop.permute.xlu1 %255  ;;  %v166_v14 = vpop.permute.xlu0 %165 }
 0x166   :  { %1728 = vmatpush3.xpose.msk.msra.mxu1 %vm167_vm2, %v166_v14 }
 0x167   :  { %1732 = vmatprep.subr.mxu1 %v1962_v6 }
 0x169   :  { %v2054_v15 = vpop.permute.xlu1 %334  ;;  %1730 = vmatmul.mubr.msk.f32.vlgmr.msra.gmra.mxu1 %vm167_vm2, %v157_v12 }
 0x16a   :  { %1733 = vmatpush3.msra.mxu1 %v256_v13  ;;  %1734 = vmatprep.mubr.msk.f32.mxu1 %vm1963_vm1, %v1962_v6 }
 0x16b   :  { %1737 = vmatprep.subr.mxu1 %v1962_v6 }
 0x16d   :  { %v2060_v16 = vpop.permute.xlu1 %332 }
 0x171   :  { %v507_v17 = vpop.permute.xlu1 %506 }
 0x172   :  { %1748 = vmatpush3.xpose.msk.msra.mxu0 %vm167_vm2, %v507_v17 }
 0x173   :  { %1757 = vmatprep.subr.mxu0 %v1962_v6 }
 0x175   :  { %v505_v18 = vpop.permute.xlu1 %504 }
 0x176   :  { %1750 = vmatmul.mubr.msk.f32.vlgmr.msra.gmra.mxu0 %vm167_vm2, %v505_v18 }
 0x177   :  { %1759 = vmatprep.mubr.msk.f32.mxu0 %vm1963_vm1, %v1962_v6 }
 0x229   :  { %v239_v23 = vpop.f32.mrf.mxu1 }
 0x22a   :  { %v243_v24 = vsel %vm2067_vm3, %v239_v23, -inf }
 0x22b   :  { %v1731_v25 = vpop.f32.mrf.mxu1  ;;  %v244_v26 = vsel %vm167_vm2, %v243_v24, -inf }
 0x22c   :  { %245 = vmax.xlane.f32.xlu0 %v244_v26 }
 0x236   :  { %v578_v27 = vpop.f32.mrf.mxu0 }
 0x237   :  { %v582_v30 = vsel %vm2067_vm3, %v578_v27, -inf }
 0x238   :  { %v1751_v28 = vpop.f32.mrf.mxu0  ;;  %v583_v31 = vsel %vm167_vm2, %v582_v30, -inf }
 0x242   :  { %678 = vrot.lane.b32.xlu0 %v2039_v11, %s1970_s14 }
 0x246   :  { %1186 = vrot.lane.b32.xlu0 %v158_v29, %s1969_s13 }
 0x24a   :  { %1357 = vrot.lane.b32.xlu0 %v158_v29, %s1971_s15 }
 0x269   :  { %584 = vmax.xlane.f32.xlu0 %v583_v31 }
 0x2b5   :  { %v246_v32 = vpop.xlane.xlu0 %245 }
 0x2b6   :  { %v247_v33 = vsub.f32 %v243_v24, %v246_v32 }
 0x2b8   :  { %v248_v34 = vmul.f32 1.442695, %v247_v33 }
 0x2b9   :  { %v679_v35 = vpop.permute.xlu0 %678 }
 0x2ba   :  { %1839 = vpow2.f32 %v248_v34  ;;  %1758 = vmatpush3.xpose.msk.msra.mxu0 %vm167_vm2, %v679_v35 }
 0x2bb   :  { %1767 = vmatprep.subr.mxu0 %v1962_v6 }
 0x2bd   :  { %v1187_v46 = vpop.permute.xlu0 %1186 }
 0x2c1   :  { %v1358_v48 = vpop.permute.xlu0 %1357 }
 0x2c7   :  { %v1840_v36 = vpop.eup %1839 }
 0x2c8   :  { %v250_v37 = vsel %vm167_vm2, %v1840_v36, 0.0 }
 0x2c9   :  { %251 = vadd.xlane.f32.xlu1 %v250_v37 }
 0x2da   :  { %676 = vrot.lane.b32.xlu1 %v157_v12, %s1971_s15 }
 0x2de   :  { %849 = vrot.lane.b32.xlu1 %v2037_v9, %s1965_s10 }
 0x2e2   :  { %1017 = vrot.lane.b32.xlu1 %v2037_v9, %s1966_s11 }
 0x2e6   :  { %1015 = vrot.lane.b32.xlu1 %v158_v29, %s1967_s2 }
 0x2ea   :  { %1188 = vrot.lane.b32.xlu1 %v2037_v9, %s1968_s12 }
 0x2ee   :  { %1359 = vrot.lane.b32.xlu1 %v2037_v9, %s1970_s14 }
 0x2f2   :  { %v585_v51 = vpop.xlane.xlu0 %584 }
 0x2f3   :  { %v586_v54 = vsub.f32 %v582_v30, %v585_v51 }
 0x2f5   :  { %v587_v56 = vmul.f32 1.442695, %v586_v54 }
 0x352   :  { %v252_v38 = vpop.xlane.xlu1 %251 }
 0x353   :  { %1841 = vrcp.f32 %v252_v38 }
 0x354   :  { %1843 = vpow2.f32 %v587_v56 }
 0x356   :  { %v677_v39 = vpop.permute.xlu1 %676 }
 0x357   :  { %1760 = vmatmul.mubr.msk.f32.vlgmr.msra.gmra.mxu0 %vm167_vm2, %v677_v39 }
 0x358   :  { %1769 = vmatprep.mubr.msk.f32.mxu0 %vm1963_vm1, %v1962_v6 }
 0x35a   :  { %v850_v40 = vpop.permute.xlu1 %849 }
 0x35b   :  { %1768 = vmatpush3.xpose.msk.msra.mxu0 %vm167_vm2, %v850_v40 }
 0x35c   :  { %1777 = vmatprep.subr.mxu0 %v1962_v6 }
 0x35e   :  { %v1018_v41 = vpop.permute.xlu1 %1017  ;;  %1770 = vmatmul.mubr.msk.f32.vlgmr.msra.gmra.mxu0 %vm167_vm2, %v158_v29 }
 0x35f   :  { %1778 = vmatpush3.xpose.msk.msra.mxu0 %vm167_vm2, %v1018_v41  ;;  %1779 = vmatprep.mubr.msk.f32.mxu0 %vm1963_vm1, %v1962_v6 }
 0x360   :  { %v1842_v42 = vpop.eup %1841  ;;  %1787 = vmatprep.subr.mxu0 %v1962_v6 }
 0x361   :  { %v254_v43 = vmul.f32 %v1842_v42, %v1840_v36 }
 0x362   :  { %v1016_v44 = vpop.permute.xlu1 %1015 }
 0x363   :  { %1735 = vmatmul.mubr.msk.f32.vlgmr.msra.gmra.mxu1 %vm167_vm2, %v254_v43  ;;  %1780 = vmatmul.mubr.msk.f32.vlgmr.msra.gmra.mxu0 %vm167_vm2, %v1016_v44 }
 0x364   :  { %1738 = vmatpush3.xpose.msk.msra.mxu1 %vm167_vm2, %v2054_v15  ;;  %1739 = vmatprep.mubr.msk.f32.mxu1 %vm1963_vm1, %v1962_v6 }
 0x365   :  { %1789 = vmatprep.mubr.msk.f32.mxu0 %vm1963_vm1, %v1962_v6  ;;  %1742 = vmatprep.subr.mxu1 %v1962_v6 }
 0x366   :  { %v1189_v45 = vpop.permute.xlu1 %1188 }
 0x367   :  { %1740 = vmatmul.mubr.msk.f32.vlgmr.msra.gmra.mxu1 %vm167_vm2, %v2060_v16  ;;  %1788 = vmatpush3.xpose.msk.msra.mxu0 %vm167_vm2, %v1189_v45  ;;  %v2142_v16 = vpop.eup %1843 }
 0x368   :  { %1797 = vmatprep.subr.mxu0 %v1962_v6  ;;  %1744 = vmatprep.mubr.msk.f32.mxu1 %vm1963_vm1, %v1962_v6  ;;  %v589_v18 = vsel %vm167_vm2, %v2142_v16, 0.0 }
 0x36a   :  { %v1360_v47 = vpop.permute.xlu1 %1359  ;;  %1790 = vmatmul.mubr.msk.f32.vlgmr.msra.gmra.mxu0 %vm167_vm2, %v1187_v46 }
 0x36b   :  { %1798 = vmatpush3.xpose.msk.msra.mxu0 %vm167_vm2, %v1360_v47  ;;  %1799 = vmatprep.mubr.msk.f32.mxu0 %vm1963_vm1, %v1962_v6 }
 0x36e   :  { %1800 = vmatmul.mubr.msk.f32.vlgmr.msra.gmra.mxu0 %vm167_vm2, %v1358_v48 }
 0x417   :  { %v750_v49 = vpop.f32.mrf.mxu0 }
 0x418   :  { %v754_v50 = vsel %vm2067_vm3, %v750_v49, -inf }
 0x419   :  { %v1761_v52 = vpop.f32.mrf.mxu0  ;;  %v755_v53 = vsel %vm167_vm2, %v754_v50, -inf }
 0x41a   :  { %756 = vmax.xlane.f32.xlu0 %v755_v53 }
 0x41e   :  { %v922_v55 = vpop.f32.mrf.mxu0 }
 0x41f   :  { %v926_v4 = vsel %vm2067_vm3, %v922_v55, -inf }
 0x420   :  { %v1771_v57 = vpop.f32.mrf.mxu0  ;;  %v927_v8 = vsel %vm167_vm2, %v926_v4, -inf }
 0x423   :  { %v327_v58 = vpop.f32.mrf.mxu1  ;;  %v1089_v59 = vpop.f32.mrf.mxu0 }
 0x424   :  { %331 = vst.msk [vmem:[#allocation2] sm:$0xff] %vm167_vm2, %v327_v58  ;;  %v1093_v60 = vsel %vm2067_vm3, %v1089_v59, -inf }
 0x425   :  { %v1736_v61 = vpop.f32.mrf.mxu1  ;;  %v1781_v62 = vpop.f32.mrf.mxu0  ;;  %v1094_v63 = vsel %vm167_vm2, %v1093_v60, -inf }
 0x426   :  { %1095 = vmax.xlane.f32.xlu0 %v1094_v63 }
 0x427   :  { %v406_v0 = vpop.f32.mrf.mxu1 }
 0x428   :  { %v2130_v1 = vsel %vm2067_vm3, %v406_v0, -inf }
 0x429   :  { %v1741_v2 = vpop.f32.mrf.mxu1  ;;  %v411_v3 = vsel %vm167_vm2, %v2130_v1, -inf }
 0x42a   :  { %v1260_v5 = vpop.f32.mrf.mxu0  ;;  %412 = vmax.xlane.f32.xlu1 %v411_v3 }
 0x42b   :  { %v1264_v10 = vsel %vm2067_vm3, %v1260_v5, -inf }
 0x42c   :  { %v1791_v7 = vpop.f32.mrf.mxu0  ;;  %v1265_v17 = vsel %vm167_vm2, %v1264_v10, -inf }
 0x42e   :  { %v1431_v12 = vpop.f32.mrf.mxu0  ;;  %928 = vmax.xlane.f32.xlu1 %v927_v8 }
 0x42f   :  { %v1435_v13 = vsel %vm2067_vm3, %v1431_v12, -inf }
 0x430   :  { %v1801_v14 = vpop.f32.mrf.mxu0  ;;  %v1436_v15 = vsel %vm167_vm2, %v1435_v13, -inf }
 0x431   :  { %1437 = vmax.xlane.f32.xlu0 %v1436_v15 }
 0x432   :  { %1266 = vmax.xlane.f32.xlu1 %v1265_v17 }
 0x435   :  { %590 = vadd.xlane.f32.xlu0 %v589_v18 }
 0x4a3   :  { %v757_v19 = vpop.xlane.xlu0 %756 }
 0x4a4   :  { %v758_v20 = vsub.f32 %v754_v50, %v757_v19 }
 0x4a6   :  { %v759_v21 = vmul.f32 1.442695, %v758_v20 }
 0x4a8   :  { %1845 = vpow2.f32 %v759_v21  ;;  %v1533_v21 = vld [vmem:[#allocation8 + $0x18] sm:$0xff] }
 0x4a9   :  { %1807 = vmatprep.subr.mxu0 %v1533_v21 }
 0x4aa   :  { %1808 = vmatpush3.msra.mxu0 %v1533_v21 }
 0x4af   :  { %v1096_v23 = vpop.xlane.xlu0 %1095 }
 0x4b0   :  { %v1097_v22 = vsub.f32 %v1093_v60, %v1096_v23  ;;  %v1532_v23 = vld [vmem:[#allocation8 + $0x10] sm:$0xff] }
 0x4b1   :  { %1809 = vmatprep.subr.mxu0 %v1532_v23 }
 0x4b2   :  { %v1098_v24 = vmul.f32 1.442695, %v1097_v22  ;;  %v1531_v22 = vld [vmem:[#allocation8 + $0x8] sm:$0xff]  ;;  %1810 = vmatpush3.msra.mxu0 %v1532_v23 }
 0x4b3   :  { %v413_v25 = vpop.xlane.xlu1 %412  ;;  %1811 = vmatprep.subr.mxu0 %v1531_v22 }
 0x4b4   :  { %1847 = vpow2.f32 %v1098_v24  ;;  %v414_v45 = vsub.f32 %v2130_v1, %v413_v25  ;;  %v1530_v25 = vld [vmem:[#allocation8] sm:$0xff]  ;;  %1812 = vmatpush3.msra.mxu0 %v1531_v22 }
 0x4b5   :  { %v2147_v26 = vpop.eup %1845  ;;  %1813 = vmatprep.subr.mxu0 %v1530_v25 }
 0x4b6   :  { %v761_v27 = vsel %vm167_vm2, %v2147_v26, 0.0  ;;  %v415_v46 = vmul.f32 1.442695, %v414_v45  ;;  %1814 = vmatpush3.msra.mxu0 %v1530_v25 }
 0x4b7   :  { %762 = vadd.xlane.f32.xlu1 %v761_v27  ;;  %v929_v28 = vpop.xlane.xlu1 %928 }
 0x4b8   :  { %v930_v29 = vsub.f32 %v926_v4, %v929_v28 }
 0x4ba   :  { %v931_v30 = vmul.f32 1.442695, %v930_v29  ;;  %v1438_v31 = vpop.xlane.xlu0 %1437 }
 0x4bb   :  { %v1439_v32 = vsub.f32 %v1435_v13, %v1438_v31  ;;  %v1267_v33 = vpop.xlane.xlu1 %1266 }
 0x4bc   :  { %1849 = vpow2.f32 %v931_v30  ;;  %v1268_v34 = vsub.f32 %v1264_v10, %v1267_v33 }
 0x4bd   :  { %v1440_v35 = vmul.f32 1.442695, %v1439_v32 }
 0x4be   :  { %v1269_v36 = vmul.f32 1.442695, %v1268_v34  ;;  %v591_v49 = vpop.xlane.xlu0 %590 }
 0x4bf   :  { %1851 = vpow2.f32 %v1440_v35 }
 0x4c0   :  { %1853 = vpow2.f32 %v1269_v36 }
 0x4c1   :  { %v2151_v37 = vpop.eup %1847  ;;  %1855 = vpow2.f32 %v415_v46 }
 0x4c2   :  { %v1100_v38 = vsel %vm167_vm2, %v2151_v37, 0.0 }
 0x4c3   :  { %1101 = vadd.xlane.f32.xlu1 %v1100_v38 }
 0x4c9   :  { %v2155_v39 = vpop.eup %1849 }
 0x4ca   :  { %v933_v40 = vsel %vm167_vm2, %v2155_v39, 0.0 }
 0x4cb   :  { %934 = vadd.xlane.f32.xlu0 %v933_v40 }
 0x4cc   :  { %v2159_v41 = vpop.eup %1851 }
 0x4cd   :  { %v2161_v42 = vpop.eup %1853  ;;  %v1442_v43 = vsel %vm167_vm2, %v2159_v41, 0.0 }
 0x4ce   :  { %1443 = vadd.xlane.f32.xlu1 %v1442_v43  ;;  %v1271_v44 = vsel %vm167_vm2, %v2161_v42, 0.0  ;;  %v1856_v47 = vpop.eup %1855 }
 0x4cf   :  { %1272 = vadd.xlane.f32.xlu0 %v1271_v44  ;;  %v417_v48 = vsel %vm167_vm2, %v1856_v47, 0.0 }
 0x4df   :  { %594 = vrot.lane.b32.xlu1 %v2039_v11, %s1972_s16 }
 0x4e5   :  { %422 = vrot.lane.b32.xlu0 %v2039_v11, %s1973_s17 }
 0x4e9   :  { %938 = vrot.lane.b32.xlu0 %v2037_v9, %s1964_s9 }
 0x4ed   :  { %1276 = vrot.lane.b32.xlu0 %v2037_v9, %s1972_s16 }
 0x503   :  { %418 = vadd.xlane.f32.xlu1 %v417_v48 }
 0x514   :  { %766 = vrot.lane.b32.xlu1 %v2039_v11, %s1974_s18 }
 0x518   :  { %1105 = vrot.lane.b32.xlu1 %v2037_v9, %s1973_s17 }
 0x51c   :  { %1447 = vrot.lane.b32.xlu1 %v2037_v9, %s1974_s18 }
 0x540   :  { %v763_v53 = vpop.xlane.xlu1 %762 }
 0x54c   :  { %v1102_v54 = vpop.xlane.xlu1 %1101 }
 0x554   :  { %v935_v50 = vpop.xlane.xlu0 %934 }
 0x557   :  { %v1444_v55 = vpop.xlane.xlu1 %1443 }
 0x558   :  { %v1273_v51 = vpop.xlane.xlu0 %1272 }
 0x55b   :  { %v595_v56 = vpop.permute.xlu1 %594 }
 0x55c   :  { %v423_v52 = vpop.permute.xlu0 %422 }
 0x55d   :  { %1743 = vmatpush3.msra.mxu1 %v423_v52 }
 0x55e   :  { %1752 = vmatprep.subr.mxu1 %v1962_v6 }
 0x560   :  { %v939_v0 = vpop.permute.xlu0 %938 }
 0x564   :  { %v1277_v7 = vpop.permute.xlu0 %1276 }
 0x58c   :  { %v419_v57 = vpop.xlane.xlu1 %418 }
 0x58d   :  { %1857 = vrcp.f32 %v419_v57 }
 0x58e   :  { %1859 = vrcp.f32 %v591_v49 }
 0x58f   :  { %1861 = vrcp.f32 %v763_v53 }
 0x590   :  { %1863 = vrcp.f32 %v935_v50  ;;  %v767_v61 = vpop.permute.xlu1 %766 }
 0x591   :  { %1865 = vrcp.f32 %v1102_v54 }
 0x592   :  { %1867 = vrcp.f32 %v1273_v51 }
 0x593   :  { %1869 = vrcp.f32 %v1444_v55 }
 0x594   :  { %v1106_v3 = vpop.permute.xlu1 %1105 }
 0x598   :  { %v1448_v12 = vpop.permute.xlu1 %1447 }
 0x59a   :  { %v1858_v11 = vpop.eup %1857 }
 0x59b   :  { %v421_v58 = vmul.f32 %v1858_v11, %v1856_v47  ;;  %v1860_v9 = vpop.eup %1859 }
 0x59c   :  { %v593_v59 = vmul.f32 %v1860_v9, %v2142_v16  ;;  %v1862_v60 = vpop.eup %1861 }
 0x59d   :  { %1745 = vmatmul.mubr.msk.f32.vlgmr.msra.gmra.mxu1 %vm167_vm2, %v421_v58  ;;  %v765_v62 = vmul.f32 %v1862_v60, %v2147_v26  ;;  %v1864_v63 = vpop.eup %1863 }
 0x59e   :  { %1753 = vmatpush3.msra.mxu1 %v595_v56  ;;  %1754 = vmatprep.mubr.msk.f32.mxu1 %vm1963_vm1, %v1962_v6  ;;  %v937_v1 = vmul.f32 %v1864_v63, %v2155_v39  ;;  %v1866_v2 = vpop.eup %1865  ;;  %v1669_v39 = vld [vmem:[%s2228_s4] ss:$0 sm:$0xff] }
 0x59f   :  { %1762 = vmatprep.subr.mxu1 %v1962_v6  ;;  %v1104_v4 = vmul.f32 %v1866_v2, %v2151_v37  ;;  %v1868_v5 = vpop.eup %1867 }
 0x5a0   :  { %v1275_v8 = vmul.f32 %v1868_v5, %v2161_v42  ;;  %v1870_v10 = vpop.eup %1869 }
 0x5a1   :  { %1755 = vmatmul.mubr.msk.f32.vlgmr.msra.gmra.mxu1 %vm167_vm2, %v593_v59  ;;  %v1446_v13 = vmul.f32 %v1870_v10, %v2159_v41 }
 0x5a2   :  { %1763 = vmatpush3.msra.mxu1 %v767_v61  ;;  %1764 = vmatprep.mubr.msk.f32.mxu1 %vm1963_vm1, %v1962_v6 }
 0x5a3   :  { %1772 = vmatprep.subr.mxu1 %v1962_v6 }
 0x5a5   :  { %1765 = vmatmul.mubr.msk.f32.vlgmr.msra.gmra.mxu1 %vm167_vm2, %v765_v62 }
 0x5a6   :  { %1773 = vmatpush3.msra.mxu1 %v939_v0  ;;  %1774 = vmatprep.mubr.msk.f32.mxu1 %vm1963_vm1, %v1962_v6 }
 0x5a7   :  { %1782 = vmatprep.subr.mxu1 %v1962_v6 }
 0x5a9   :  { %1775 = vmatmul.mubr.msk.f32.vlgmr.msra.gmra.mxu1 %vm167_vm2, %v937_v1 }
 0x5aa   :  { %1783 = vmatpush3.msra.mxu1 %v1106_v3  ;;  %1784 = vmatprep.mubr.msk.f32.mxu1 %vm1963_vm1, %v1962_v6 }
 0x5ab   :  { %1792 = vmatprep.subr.mxu1 %v1962_v6 }
 0x5ad   :  { %1785 = vmatmul.mubr.msk.f32.vlgmr.msra.gmra.mxu1 %vm167_vm2, %v1104_v4 }
 0x5ae   :  { %1793 = vmatpush3.msra.mxu1 %v1277_v7  ;;  %1794 = vmatprep.mubr.msk.f32.mxu1 %vm1963_vm1, %v1962_v6 }
 0x5af   :  { %1802 = vmatprep.subr.mxu1 %v1962_v6 }
 0x5b1   :  { %1795 = vmatmul.mubr.msk.f32.vlgmr.msra.gmra.mxu1 %vm167_vm2, %v1275_v8 }
 0x5b2   :  { %1803 = vmatpush3.msra.mxu1 %v1448_v12  ;;  %1804 = vmatprep.mubr.msk.f32.mxu1 %vm1963_vm1, %v1962_v6 }
 0x5b5   :  { %1805 = vmatmul.mubr.msk.f32.vlgmr.msra.gmra.mxu1 %vm167_vm2, %v1446_v13 }
 0x65d   :  { %v494_v14 = vpop.f32.mrf.mxu1 }
 0x65e   :  { %499 = vrot.lane.b32.xlu0 %v494_v14, %s1960_s24 }
 0x65f   :  { %v1746_v15 = vpop.f32.mrf.mxu1 }
 0x661   :  { %v666_v16 = vpop.f32.mrf.mxu1 }
 0x662   :  { %671 = vrot.lane.b32.xlu1 %v666_v16, %s1975_s19 }
 0x663   :  { %v1756_v17 = vpop.f32.mrf.mxu1 }
 0x665   :  { %v838_v18 = vpop.f32.mrf.mxu1 }
 0x666   :  { %843 = vrot.lane.b32.xlu1 %v838_v18, %s1976_s20 }
 0x667   :  { %v1766_v19 = vpop.f32.mrf.mxu1 }
 0x669   :  { %v1010_v20 = vpop.f32.mrf.mxu1 }
 0x66a   :  { %1014 = vst.msk [vmem:[#allocation2 + $0x8] sm:$0xff] %vm167_vm2, %v1010_v20 }
 0x66b   :  { %v1776_v6 = vpop.f32.mrf.mxu1 }
 0x66d   :  { %v1177_v24 = vpop.f32.mrf.mxu1 }
 0x66e   :  { %1182 = vrot.lane.b32.xlu0 %v1177_v24, %s1960_s24 }
 0x66f   :  { %v1786_v26 = vpop.f32.mrf.mxu1 }
 0x671   :  { %v1348_v27 = vpop.f32.mrf.mxu1 }
 0x672   :  { %1353 = vrot.lane.b32.xlu0 %v1348_v27, %s1975_s19 }
 0x673   :  { %v1796_v28 = vpop.f32.mrf.mxu1 }
 0x675   :  { %v1519_v29 = vpop.f32.mrf.mxu1 }
 0x676   :  { %1524 = vrot.lane.b32.xlu1 %v1519_v29, %s1976_s20 }
 0x677   :  { %v1806_v30 = vpop.f32.mrf.mxu1 }
 0x6d0   :  { %v500_v31 = vpop.permute.xlu0 %499 }
 0x6d1   :  { %503 = vst.msk [vmem:[#allocation2] sm:$0xff] %vm502_vm4, %v500_v31 }
 0x6d4   :  { %v672_v32 = vpop.permute.xlu1 %671 }
 0x6d5   :  { %675 = vst.msk [vmem:[#allocation2] sm:$0xff] %vm674_vm5, %v672_v32 }
 0x6d8   :  { %v844_v33 = vpop.permute.xlu1 %843 }
 0x6d9   :  { %847 = vst.msk [vmem:[#allocation2] sm:$0xff] %vm846_vm6, %v844_v33 }
 0x6e0   :  { %v1183_v34 = vpop.permute.xlu0 %1182  ;;  %v1528_v35 = vld [vmem:[#allocation2] sm:$0xff] }
 0x6e1   :  { %1185 = vst.msk [vmem:[#allocation2 + $0x8] sm:$0xff] %vm502_vm4, %v1183_v34  ;;  %1815 = vmatprep.mubr.msk.f32.mxu0 %vm75_vm0, %v1528_v35 }
 0x6e4   :  { %v1354_v36 = vpop.permute.xlu0 %1353 }
 0x6e5   :  { %1356 = vst.msk [vmem:[#allocation2 + $0x8] sm:$0xff] %vm674_vm5, %v1354_v36 }
 0x6e8   :  { %v1525_v37 = vpop.permute.xlu1 %1524 }
 0x6e9   :  { %1527 = vst.msk [vmem:[#allocation2 + $0x8] sm:$0xff] %vm846_vm6, %v1525_v37 }
 0x6f0   :  { %v1529_v38 = vld [vmem:[#allocation2 + $0x8] sm:$0xff] }
 0x6f1   :  { %1816 = vmatmul.mubr.msk.f32.vlgmr.msra.gmra.mxu0 %vm75_vm0, %v1529_v38 }
 0x7b1   :  { %v1817_v40 = vpop.f32.mrf.mxu0 }
 0x7b2   :  { %v1619_v41 = vadd.f32 %v1817_v40, %v1669_v39 }
 0x7b3   :  { %v1613_v42 = vpop.f32.mrf.mxu0 }
 0x7b4   :  { %1623 = vst.msk [vmem:[#allocation9 + $0x8] sm:$0xff] %vm75_vm0, %v1619_v41  ;;  %v1614_v43 = vadd.f32 %v1669_v39, %v1613_v42 }
 0x7b6   :  { %1622 = vst.msk [vmem:[#allocation9] sm:$0xff] %vm75_vm0, %v1614_v43 }
 0x7b7   :  { %1942 = shalt.err (!%p1939_p5)
}
 0x7b8   :  { %1635 = dma.vmem_to_hbm [thread:$0]  %s1630_s26, 256, %s2229_s5, [#allocation5], %s1959_s23, %s1959_s23, %s1960_s24  }
 0x7b9   :  { %1955 = dma.done.wait [#allocation5], 256  }
 0x7ba   :  { %1956 = vsyncadd [#allocation5], 4294967040 }
 0x7bb   :  { %1639 = vsyncpa [#allocation4], 1 }
 0x7bc   :  { %1640 = vsyncpa [#allocation7], 1 }
 0x7bd   :  { %1641 = vsyncpa [#allocation5], 1 }

</bundles_post_ra>
